<compile_context>
chip_gen: v6e
topology: v6e:2x2x1
jax: 0.10.0
libtpu: 0.0.40
codegen_flags: <defaults>
</compile_context>

<pallas_src>
import jax
import jax.numpy as jnp
from jax.experimental import pallas as pl
from jax.experimental.pallas import tpu as pltpu

_LANE = 128
_MAX_TILE_N = 24 * 1024  # lane-padded f32 input buffer = 12 MiB; 24 MiB double-buffered


def cnn_classifier_kernel(x_ref, w1_ref, b1_ref, w2_ref, b2_ref, w3t_ref, b3_ref, o_ref):
    # x_ref: (Tn, 20) native layout; w1: (11, 20); w2: (5, 11); w3t: (5, 1);
    # biases (C_out, 1); o_ref: (1, Tn).
    x = x_ref[...]

    # conv1 (center tap) + ReLU.  Contract the feature dim of both operands so
    # the result is lane-dense (11, Tn) without any transpose of the big tile
    # in the wrapper.
    h1 = jax.lax.dot_general(
        w1_ref[...], x, (((1,), (1,)), ((), ())),
        precision=jax.lax.Precision.HIGHEST,
        preferred_element_type=jnp.float32) + b1_ref[...]
    h1 = jnp.maximum(h1, 0.0)                                   # (11, Tn)

    # conv2 (center tap) + ReLU -> (5, Tn)
    h2 = jnp.dot(w2_ref[...], h1,
                 precision=jax.lax.Precision.HIGHEST,
                 preferred_element_type=jnp.float32) + b2_ref[...]
    h2 = jnp.maximum(h2, 0.0)                                   # (5, Tn)

    # conv3 (center tap, C_out = 1) + sigmoid.  Tiny 1x5 contraction done on
    # the VPU/XLU (broadcast-mul + sublane sum); w3 arrives pre-transposed.
    logits = jnp.sum(w3t_ref[...] * h2, axis=0, keepdims=True) + b3_ref[...]
    o_ref[...] = jax.nn.sigmoid(logits)                         # (1, Tn) lane-dense store


def _pick_tile(n):
    """Lane tile (multiple of 128); ensure >=2 grid steps when there is enough work."""
    n_lanes = ((n + _LANE - 1) // _LANE) * _LANE
    tile = min(n_lanes, _MAX_TILE_N)
    if n_lanes > _LANE and -(-n // tile) < 2:   # single-step grid would idle one v7x TC
        half = (n + 1) // 2
        tile = ((half + _LANE - 1) // _LANE) * _LANE
    return tile


def init_params(key):
    """Deterministic PyTorch-style Conv1d init (uniform +-1/sqrt(fan_in*k))."""
    def conv1d_params(key, c_in, c_out, k=5):
        kw, kb = jax.random.split(key)
        bound = 1.0 / jnp.sqrt(float(c_in * k))
        w = jax.random.uniform(kw, (c_out, c_in, k), jnp.float32, -bound, bound)
        b = jax.random.uniform(kb, (c_out,), jnp.float32, -bound, bound)
        return w, b

    k1, k2, k3 = jax.random.split(key, 3)
    w1, b1 = conv1d_params(k1, 20, 11)
    w2, b2 = conv1d_params(k2, 11, 5)
    w3, b3 = conv1d_params(k3, 5, 1)
    return (w1, b1), (w2, b2), (w3, b3)


@jax.jit
def cnn_classifier_forward(x, w1, b1, w2, b2, w3, b3):
    # Mirror torch.reshape(x, (-1, 20, 1)); the length-1 conv axis is squeezed.
    x2d = jnp.reshape(x, (-1, 20)).astype(jnp.float32)          # native layout, no transpose/pad
    n = x2d.shape[0]

    tile_n = _pick_tile(n)
    grid = (pl.cdiv(n, tile_n),)   # tail block reads padded lanes; per-lane math, OOB writes dropped

    # Only the center kernel tap (index 2) contributes when spatial length == 1.
    w1c = w1[:, :, 2]              # (11, 20)
    w2c = w2[:, :, 2]              # (5, 11)
    w3t = w3[:, :, 2].T            # (5, 1)  pre-transposed for the VPU layer
    b1c = b1.reshape(-1, 1)        # (11, 1)
    b2c = b2.reshape(-1, 1)        # (5, 1)
    b3c = b3.reshape(-1, 1)        # (1, 1)

    const = lambda i: (0, 0)       # weights/biases stay VMEM-resident across grid steps

    out = pl.pallas_call(
        cnn_classifier_kernel,
        out_shape=jax.ShapeDtypeStruct((1, n), jnp.float32),
        grid=grid,
        in_specs=[
            pl.BlockSpec((tile_n, 20), lambda i: (i, 0)),   # x in native (N, 20) layout
            pl.BlockSpec((11, 20), const),                  # w1
            pl.BlockSpec((11, 1), const),                   # b1
            pl.BlockSpec((5, 11), const),                   # w2
            pl.BlockSpec((5, 1), const),                    # b2
            pl.BlockSpec((5, 1), const),                    # w3 (pre-transposed)
            pl.BlockSpec((1, 1), const),                    # b3
        ],
        out_specs=pl.BlockSpec((1, tile_n), lambda i: (0, i)),  # lane-dense store
        compiler_params=pltpu.CompilerParams(
            dimension_semantics=("parallel",),
            vmem_limit_bytes=48 * 1024 * 1024,              # < 64 MiB v7x physical, ample headroom
        ),
    )(x2d, w1c, b1c, w2c, b2c, w3t, b3c)

    return out[0]                  # mirrors x.view(-1)


if __name__ == "__main__":
    key = jax.random.PRNGKey(0)
    kx, kp = jax.random.split(key)

    # Small deterministic input: 8 samples of 20 features -> reshaped (8, 20, 1).
    x = jax.random.normal(kx, (8, 20), dtype=jnp.float32)

    (w1, b1), (w2, b2), (w3, b3) = init_params(kp)

    y = cnn_classifier_forward(x, w1, b1, w2, b2, w3, b3)
    jax.block_until_ready(y)

    # Pure-JAX reference (same center-tap math, same HIGHEST precision).
    hi = jax.lax.Precision.HIGHEST
    h1 = jnp.maximum(jnp.dot(x, w1[:, :, 2].T, precision=hi) + b1, 0.0)
    h2 = jnp.maximum(jnp.dot(h1, w2[:, :, 2].T, precision=hi) + b2, 0.0)
    ref = jax.nn.sigmoid(jnp.dot(h2, w3[:, :, 2].T, precision=hi) + b3).reshape(-1)
    assert y.shape == (8,)
    assert jnp.allclose(y, ref, atol=1e-5), "mismatch vs reference"

    print("KERNEL_OK")
</pallas_src>

<mosaic_0001>
module attributes {stable_mosaic.version = 11 : i64} {
  func.func @cnn_classifier_kernel(%arg0: i32, %arg1: memref<128x20xf32, #tpu.memory_space<vmem>>, %arg2: memref<11x20xf32, #tpu.memory_space<vmem>>, %arg3: memref<11x1xf32, #tpu.memory_space<vmem>>, %arg4: memref<5x11xf32, #tpu.memory_space<vmem>>, %arg5: memref<5x1xf32, #tpu.memory_space<vmem>>, %arg6: memref<5x1xf32, #tpu.memory_space<vmem>>, %arg7: memref<1x1xf32, #tpu.memory_space<vmem>>, %arg8: memref<1x128xf32, #tpu.memory_space<vmem>>) attributes {dimension_semantics = [#tpu.dimension_semantics<parallel>], iteration_bounds = array<i64: 1>, scalar_prefetch = 0 : i64, scratch_operands = 0 : i64, tpu.core_type = #tpu.core_type<tc>, window_params = [{transform_indices = @transform_0, window_bounds = array<i64: 128, 20>}, {pipeline_mode = #tpu.pipeline_mode<synchronous>, transform_indices = @transform_1, window_bounds = array<i64: 11, 20>}, {pipeline_mode = #tpu.pipeline_mode<synchronous>, transform_indices = @transform_2, window_bounds = array<i64: 11, 1>}, {pipeline_mode = #tpu.pipeline_mode<synchronous>, transform_indices = @transform_3, window_bounds = array<i64: 5, 11>}, {pipeline_mode = #tpu.pipeline_mode<synchronous>, transform_indices = @transform_4, window_bounds = array<i64: 5, 1>}, {pipeline_mode = #tpu.pipeline_mode<synchronous>, transform_indices = @transform_5, window_bounds = array<i64: 5, 1>}, {pipeline_mode = #tpu.pipeline_mode<synchronous>, transform_indices = @transform_6, window_bounds = array<i64: 1, 1>}, {transform_indices = @transform_7, window_bounds = array<i64: 1, 128>}]} {
    %c0 = arith.constant 0 : index
    %c0_0 = arith.constant 0 : index
    %0 = vector.load %arg1[%c0, %c0_0] : memref<128x20xf32, #tpu.memory_space<vmem>>, vector<128x20xf32>
    %c0_1 = arith.constant 0 : index
    %c0_2 = arith.constant 0 : index
    %1 = vector.load %arg2[%c0_1, %c0_2] : memref<11x20xf32, #tpu.memory_space<vmem>>, vector<11x20xf32>
    %cst = arith.constant dense<0.000000e+00> : vector<11x128xf32>
    %2 = tpu.matmul %1, %0, %cst {dimension_numbers = #tpu.dot_dimension_numbers<[1], [1], [0], [0], [0, 0, 1, 0], [], []>, precision = #tpu.contract_precision<fp32>} : vector<11x20xf32>, vector<128x20xf32>, vector<11x128xf32> -> vector<11x128xf32>
    %c0_3 = arith.constant 0 : index
    %c0_4 = arith.constant 0 : index
    %3 = vector.load %arg3[%c0_3, %c0_4] : memref<11x1xf32, #tpu.memory_space<vmem>>, vector<11x1xf32>
    %4 = vector.broadcast %3 : vector<11x1xf32> to vector<11x128xf32>
    %5 = arith.addf %2, %4 : vector<11x128xf32>
    %cst_5 = arith.constant 0.000000e+00 : f32
    %6 = vector.broadcast %cst_5 : f32 to vector<11x128xf32>
    %7 = arith.maximumf %5, %6 : vector<11x128xf32>
    %c0_6 = arith.constant 0 : index
    %c0_7 = arith.constant 0 : index
    %8 = vector.load %arg4[%c0_6, %c0_7] : memref<5x11xf32, #tpu.memory_space<vmem>>, vector<5x11xf32>
    %cst_8 = arith.constant dense<0.000000e+00> : vector<5x128xf32>
    %9 = tpu.matmul %8, %7, %cst_8 {dimension_numbers = #tpu.dot_dimension_numbers<[1], [0], [0], [1], [0, 0, 1, 1], [], []>, precision = #tpu.contract_precision<fp32>} : vector<5x11xf32>, vector<11x128xf32>, vector<5x128xf32> -> vector<5x128xf32>
    %c0_9 = arith.constant 0 : index
    %c0_10 = arith.constant 0 : index
    %10 = vector.load %arg5[%c0_9, %c0_10] : memref<5x1xf32, #tpu.memory_space<vmem>>, vector<5x1xf32>
    %11 = vector.broadcast %10 : vector<5x1xf32> to vector<5x128xf32>
    %12 = arith.addf %9, %11 : vector<5x128xf32>
    %cst_11 = arith.constant 0.000000e+00 : f32
    %13 = vector.broadcast %cst_11 : f32 to vector<5x128xf32>
    %14 = arith.maximumf %12, %13 : vector<5x128xf32>
    %c0_12 = arith.constant 0 : index
    %c0_13 = arith.constant 0 : index
    %15 = vector.load %arg6[%c0_12, %c0_13] : memref<5x1xf32, #tpu.memory_space<vmem>>, vector<5x1xf32>
    %16 = vector.broadcast %15 : vector<5x1xf32> to vector<5x128xf32>
    %17 = arith.mulf %16, %14 : vector<5x128xf32>
    %cst_14 = arith.constant dense<0.000000e+00> : vector<128xf32>
    %18 = vector.multi_reduction <add>, %17, %cst_14 [0] : vector<5x128xf32> to vector<128xf32>
    %19 = vector.shape_cast %18 : vector<128xf32> to vector<1x128xf32>
    %c0_15 = arith.constant 0 : index
    %c0_16 = arith.constant 0 : index
    %20 = vector.load %arg7[%c0_15, %c0_16] : memref<1x1xf32, #tpu.memory_space<vmem>>, vector<1x1xf32>
    %21 = vector.broadcast %20 : vector<1x1xf32> to vector<1x128xf32>
    %22 = arith.addf %19, %21 : vector<1x128xf32>
    %23 = arith.negf %22 : vector<1x128xf32>
    %24 = math.exp %23 : vector<1x128xf32>
    %cst_17 = arith.constant 1.000000e+00 : f32
    %25 = vector.broadcast %cst_17 : f32 to vector<1x128xf32>
    %26 = arith.addf %25, %24 : vector<1x128xf32>
    %27 = arith.divf %25, %26 : vector<1x128xf32>
    %c0_18 = arith.constant 0 : index
    %c0_19 = arith.constant 0 : index
    %28 = vector.load %arg8[%c0_18, %c0_19] : memref<1x128xf32, #tpu.memory_space<vmem>>, vector<1x128xf32>
    tpu.vector_store %arg8[%c0_18, %c0_19], %27 {strides = array<i32>} : memref<1x128xf32, #tpu.memory_space<vmem>>, vector<1x128xf32>,
    return
  }
  func.func @transform_0(%arg0: i32) -> (i32, i32) {
    %c0_i32 = arith.constant 0 : i32
    %c0_i32_0 = arith.constant 0 : i32
    return %arg0, %c0_i32 : i32, i32
  }
  func.func @transform_1(%arg0: i32) -> (i32, i32) {
    %c0_i32 = arith.constant 0 : i32
    %c0_i32_0 = arith.constant 0 : i32
    %c0_i32_1 = arith.constant 0 : i32
    return %c0_i32, %c0_i32_0 : i32, i32
  }
  func.func @transform_2(%arg0: i32) -> (i32, i32) {
    %c0_i32 = arith.constant 0 : i32
    %c0_i32_0 = arith.constant 0 : i32
    %c0_i32_1 = arith.constant 0 : i32
    return %c0_i32, %c0_i32_0 : i32, i32
  }
  func.func @transform_3(%arg0: i32) -> (i32, i32) {
    %c0_i32 = arith.constant 0 : i32
    %c0_i32_0 = arith.constant 0 : i32
    %c0_i32_1 = arith.constant 0 : i32
    return %c0_i32, %c0_i32_0 : i32, i32
  }
  func.func @transform_4(%arg0: i32) -> (i32, i32) {
    %c0_i32 = arith.constant 0 : i32
    %c0_i32_0 = arith.constant 0 : i32
    %c0_i32_1 = arith.constant 0 : i32
    return %c0_i32, %c0_i32_0 : i32, i32
  }
  func.func @transform_5(%arg0: i32) -> (i32, i32) {
    %c0_i32 = arith.constant 0 : i32
    %c0_i32_0 = arith.constant 0 : i32
    %c0_i32_1 = arith.constant 0 : i32
    return %c0_i32, %c0_i32_0 : i32, i32
  }
  func.func @transform_6(%arg0: i32) -> (i32, i32) {
    %c0_i32 = arith.constant 0 : i32
    %c0_i32_0 = arith.constant 0 : i32
    %c0_i32_1 = arith.constant 0 : i32
    return %c0_i32, %c0_i32_0 : i32, i32
  }
  func.func @transform_7(%arg0: i32) -> (i32, i32) {
    %c0_i32 = arith.constant 0 : i32
    %c0_i32_0 = arith.constant 0 : i32
    return %c0_i32, %arg0 : i32, i32
  }
}

</mosaic_0001>

<bundles_post_ra>
// kernel: cnn_classifier_forward.1
= control target key start
LH: loop header
LB: loop body
LE: loop exit
PB: predicated region body
PF: predicated region fallthrough
CT: control target
= control target key end

     0   :  { %s2250_s0 = inlined_call_operand.vmem [shape: f32[8,20], index: 0, kind: input, shape index: {}]   ;;  %s2251_s1 = inlined_call_operand.vmem [shape: f32[11,20], index: 1, kind: input, shape index: {}]   ;;  %s2252_s2 = inlined_call_operand.vmem [shape: f32[11,1], index: 2, kind: input, shape index: {}]   ;;  %s2253_s3 = inlined_call_operand.vmem [shape: f32[5,11], index: 3, kind: input, shape index: {}]   ;;  %s2254_s4 = inlined_call_operand.vmem [shape: f32[5,1], index: 4, kind: input, shape index: {}]   ;;  %s2255_s5 = inlined_call_operand.vmem [shape: f32[5,1], index: 5, kind: input, shape index: {}]   ;;  %s2256_s6 = inlined_call_operand.<no memory space> [shape: f32[1,1], index: 6, kind: input, shape index: {}]   ;;  %s2257_s7 = inlined_call_operand.hbm [shape: f32[1,8], index: 7, kind: output, shape index: {}]  }
   0x1   :  { %v12_v0 = vstv %s2256_s6 }
   0x2   :  { %13 = vst [vmem:[#allocation2] sm:$0x1] %v12_v0 }
   0x3   :  { %v44_v1 = vld [vmem:[%s2250_s0 + $0x78] sm:$0xff]  ;;  %vm59_vm0 = vcmask 162816   ;;  %v43_v2 = vld [vmem:[%s2250_s0 + $0x70] sm:$0xff]  ;;  %v42_v3 = vld [vmem:[%s2250_s0 + $0x68] sm:$0xff] }
   0x4   :  { %v112_v4 = vsel %vm59_vm0, %v44_v1, 0  ;;  %v109_v5 = vsel %vm59_vm0, %v43_v2, 0  ;;  %v106_v6 = vsel %vm59_vm0, %v42_v3, 0  ;;  %v41_v7 = vld [vmem:[%s2250_s0 + $0x60] sm:$0xff]  ;;  %v40_v8 = vld [vmem:[%s2250_s0 + $0x58] sm:$0xff]  ;;  %v39_v13 = vld [vmem:[%s2250_s0 + $0x50] sm:$0xff] }
   0x5   :  { %v1798_v9 = vand.u32 4294901760, %v112_v4  ;;  %v1800_v10 = vand.u32 4294901760, %v109_v5  ;;  %v1802_v11 = vand.u32 4294901760, %v106_v6  ;;  %v103_v12 = vsel %vm59_vm0, %v41_v7, 0  ;;  %v38_v25 = vld [vmem:[%s2250_s0 + $0x48] sm:$0xff] }
   0x6   :  { %v1808_v14 = vand.u32 4294901760, %v103_v12  ;;  %v100_v15 = vsel %vm59_vm0, %v40_v8, 0  ;;  %v97_v20 = vsel %vm59_vm0, %v39_v13, 0 }
   0x7   :  { %1449 = vmatprep.subr.mxu0 %v1798_v9  ;;  %v1813_v16 = vsub.f32 %v112_v4, %v1798_v9  ;;  %v1816_v17 = vsub.f32 %v109_v5, %v1800_v10  ;;  %v1819_v18 = vsub.f32 %v106_v6, %v1802_v11  ;;  %v1822_v19 = vand.u32 4294901760, %v100_v15 }
   0x8   :  { %1450 = vmatpush3.xpose.msra.mxu0 %v1798_v9  ;;  %v1836_v24 = vsub.f32 %v103_v12, %v1808_v14 }
   0x9   :  { %1451 = vmatprep.subr.mxu0 %v1800_v10  ;;  %v1827_v21 = vand.u32 4294901760, %v1813_v16  ;;  %v1830_v22 = vand.u32 4294901760, %v1816_v17  ;;  %v1833_v23 = vand.u32 4294901760, %v1819_v18 }
   0xa   :  { %14 = vsyncpa [#allocation4], 0  ;;  %v1846_v28 = vand.u32 4294901760, %v97_v20  ;;  %v94_v29 = vsel %vm59_vm0, %v38_v25, 0  ;;  %v1850_v30 = vsub.f32 %v100_v15, %v1822_v19  ;;  %v1856_v34 = vand.u32 4294901760, %v1836_v24  ;;  %v37_v35 = vld [vmem:[%s2250_s0 + $0x40] sm:$0xff] }
   0xb   :  { %v219_v26 = vsub.f32 %v1813_v16, %v1827_v21  ;;  %v226_v27 = vsub.f32 %v1816_v17, %v1830_v22  ;;  %v233_v33 = vsub.f32 %v1819_v18, %v1833_v23  ;;  %v1862_v36 = vand.u32 4294901760, %v94_v29  ;;  %v36_v42 = vld [vmem:[%s2250_s0 + $0x38] sm:$0xff]  ;;  %v45_v49 = vld [vmem:[%s2251_s1] sm:$0xff]  ;;  %v35_v50 = vld [vmem:[%s2250_s0 + $0x30] sm:$0xff] }
   0xc   :  { %1452 = vmatpush3.xpose.msra.mxu0 %v1800_v10  ;;  %v1865_v37 = vsub.f32 %v97_v20, %v1846_v28  ;;  %v240_v39 = vsub.f32 %v1836_v24, %v1856_v34  ;;  %v1871_v40 = vand.u32 4294901760, %v1850_v30  ;;  %v91_v41 = vsel %vm59_vm0, %v37_v35, 0  ;;  %v34_v58 = vld [vmem:[%s2250_s0 + $0x28] sm:$0xff]  ;;  %v33_v4 = vld [vmem:[%s2250_s0 + $0x20] sm:$0xff] }
   0xd   :  { %1453 = vmatprep.subr.mxu0 %v1802_v11  ;;  %v220_v31 = vand.u32 4294901760, %v219_v26  ;;  %v227_v32 = vand.u32 4294901760, %v226_v27  ;;  %v234_v38 = vand.u32 4294901760, %v233_v33  ;;  %v1882_v44 = vsub.f32 %v94_v29, %v1862_v36  ;;  %v48_v0 = vld [vmem:[%s2252_s2 + $0x8] sm:$0x7]  ;;  %v47_v15 = vld [vmem:[%s2252_s2] sm:$0xff] }
   0xe   :  { %v1879_v43 = vand.u32 4294901760, %v1865_v37  ;;  %v241_v45 = vand.u32 4294901760, %v240_v39  ;;  %v247_v46 = vsub.f32 %v1850_v30, %v1871_v40  ;;  %v1887_v47 = vand.u32 4294901760, %v91_v41  ;;  %v32_v27 = vld [vmem:[%s2250_s0 + $0x18] sm:$0xff] }
   0xf   :  { %1484 = vmatprep.subr.mxu1 %v220_v31  ;;  %v88_v48 = vsel %vm59_vm0, %v36_v42, 0  ;;  %v1902_v53 = vand.u32 4294901760, %v1882_v44  ;;  %v61_v54 = vsel %vm59_vm0, %v45_v49, 0  ;;  %v85_v56 = vsel %vm59_vm0, %v35_v50, 0 }
  0x10   :  { %1454 = vmatpush3.xpose.msra.mxu0 %v1802_v11  ;;  %1485 = vmatpush3.xpose.msra.mxu1 %v220_v31  ;;  %v254_v51 = vsub.f32 %v1865_v37, %v1879_v43  ;;  %v1899_v52 = vand.u32 4294901760, %v88_v48  ;;  %v248_v55 = vand.u32 4294901760, %v247_v46  ;;  %v1908_v57 = vsub.f32 %v91_v41, %v1887_v47  ;;  %v31_v41 = vld [vmem:[%s2250_s0 + $0x10] sm:$0xff] }
  0x11   :  { %1455 = vmatprep.subr.mxu0 %v1808_v14  ;;  %1486 = vmatprep.subr.mxu1 %v227_v32  ;;  %v1913_v59 = vand.u32 4294901760, %v61_v54  ;;  %v1920_v62 = vand.u32 4294901760, %v85_v56  ;;  %v82_v63 = vsel %vm59_vm0, %v34_v58, 0  ;;  %v261_v1 = vsub.f32 %v1882_v44, %v1902_v53 }
  0x12   :  { %v255_v61 = vand.u32 4294901760, %v254_v51  ;;  %v1930_v2 = vand.u32 4294901760, %v1908_v57  ;;  %v1933_v3 = vsub.f32 %v88_v48, %v1899_v52  ;;  %v1733_v6 = vmov 0   ;;  %v30_v51 = vld [vmem:[%s2250_s0 + $0x8] sm:$0xff] }
  0x13   :  { %v1916_v60 = vsub.f32 %v61_v54, %v1913_v59  ;;  %1516 = vmatprep.mubr.f32.mxu1 %v1913_v59  ;;  %1705 = vset.pattern.permute.xlu0 %v1733_v6  ;;  %v1943_v8 = vand.u32 4294901760, %v82_v63  ;;  %v79_v12 = vsel %vm59_vm0, %v33_v4, 0  ;;  %v1947_v13 = vsub.f32 %v85_v56, %v1920_v62 }
  0x14   :  { %1456 = vmatpush3.xpose.msra.mxu0 %v1808_v14  ;;  %1487 = vmatpush3.xpose.msra.mxu1 %v227_v32  ;;  %v262_v20 = vand.u32 4294901760, %v261_v1  ;;  %v268_v25 = vsub.f32 %v1908_v57, %v1930_v2  ;;  %v1956_v26 = vand.u32 4294901760, %v1933_v3  ;;  %v1962_v31 = vand.u32 4294901760, %v79_v12  ;;  %v46_v1 = vld [vmem:[%s2251_s1 + $0x8] sm:$0x7] }
  0x15   :  { %1457 = vmatprep.subr.mxu0 %v1822_v19  ;;  %1488 = vmatprep.subr.mxu1 %v234_v38  ;;  %v197_v5 = vand.u32 4294901760, %v1916_v60  ;;  %v76_v32 = vsel %vm59_vm0, %v32_v27, 0  ;;  %v1972_v39 = vsub.f32 %v82_v63, %v1943_v8  ;;  %vm1735_vm1 = vmmov 0  }
  0x16   :  { %1706 = vset.pattern.permute.xlu1 %v1733_v6  ;;  %56 = vperm.xlu0 %1705, %v48_v0   ;;  %v269_v33 = vand.u32 4294901760, %v268_v25  ;;  %v275_v35 = vsub.f32 %v1933_v3, %v1956_v26  ;;  %v1978_v42 = vand.u32 4294901760, %v76_v32  ;;  %v1988_v50 = vsub.f32 %v79_v12, %v1962_v31  ;;  %v29_v0 = vld [vmem:[%s2250_s0] sm:$0xff] }
  0x17   :  { %v198_v7 = vsub.f32 %v1916_v60, %v197_v5  ;;  %v1985_v49 = vand.u32 4294901760, %v1972_v39  ;;  %v67_v6 = vsel %vm59_vm0, %v29_v0, 0  ;;  %vm807_vm2 = vcmask 89088  }
  0x18   :  { %1458 = vmatpush3.xpose.msra.mxu0 %v1822_v19  ;;  %1489 = vmatpush3.xpose.msra.mxu1 %v234_v38  ;;  %v1969_v38 = vand.u32 4294901760, %v1947_v13  ;;  %v276_v46 = vand.u32 4294901760, %v275_v35  ;;  %v2004_v63 = vsub.f32 %v76_v32, %v1978_v42  ;;  %vm811_vm3 = vcmask 1042432  }
  0x19   :  { %1459 = vmatprep.subr.mxu0 %v1846_v28  ;;  %1490 = vmatprep.subr.mxu1 %v241_v45  ;;  %v199_v29 = vand.u32 4294901760, %v198_v7  ;;  %v289_v58 = vsub.f32 %v1972_v39, %v1985_v49  ;;  %v64_v7 = vsel %vm59_vm0, %v46_v1, 0  ;;  %vm1282_vm4 = vcmask 1044480  }
  0x1a   :  { %51 = vperm.xlu0 %1705, %v47_v15   ;;  %v282_v48 = vsub.f32 %v1947_v13, %v1969_v38  ;;  %v2026_v27 = vand.u32 4294901760, %v64_v7 }
  0x1b   :  { %1481 = vmatprep.mubr.f32.mxu0 %v199_v29  ;;  %v290_v12 = vand.u32 4294901760, %v289_v58  ;;  %v2029_v29 = vand.u32 4294901760, %v67_v6 }
  0x1c   :  { %1460 = vmatpush3.xpose.msra.mxu0 %v1846_v28  ;;  %1491 = vmatpush3.xpose.msra.mxu1 %v241_v45  ;;  %v73_v45 = vsel %vm59_vm0, %v31_v41, 0  ;;  %v283_v56 = vand.u32 4294901760, %v282_v48 }
  0x1d   :  { %1461 = vmatprep.subr.mxu0 %v1862_v36  ;;  %1492 = vmatprep.subr.mxu1 %v248_v55  ;;  %v1994_v54 = vand.u32 4294901760, %v73_v45 }
  0x1f   :  { %v2024_v25 = vsub.f32 %v73_v45, %v1994_v54  ;;  %v2041_v45 = vsub.f32 %v64_v7, %v2026_v27 }
  0x20   :  { %1462 = vmatpush3.xpose.msra.mxu0 %v1862_v36  ;;  %1493 = vmatpush3.xpose.msra.mxu1 %v248_v55  ;;  %v70_v55 = vsel %vm59_vm0, %v30_v51, 0 }
  0x21   :  { %1463 = vmatprep.subr.mxu0 %v1887_v47  ;;  %1494 = vmatprep.subr.mxu1 %v255_v61  ;;  %v2013_v4 = vand.u32 4294901760, %v70_v55  ;;  %v2035_v35 = vand.u32 4294901760, %v2024_v25 }
  0x23   :  { %v2038_v41 = vsub.f32 %v70_v55, %v2013_v4  ;;  %v310_v48 = vsub.f32 %v2024_v25, %v2035_v35  ;;  %v207_v55 = vand.u32 4294901760, %v2041_v45 }
  0x24   :  { %1464 = vmatpush3.xpose.msra.mxu0 %v1887_v47  ;;  %1495 = vmatpush3.xpose.msra.mxu1 %v255_v61  ;;  %v2001_v61 = vand.u32 4294901760, %v1988_v50 }
  0x25   :  { %1465 = vmatprep.subr.mxu0 %v1899_v52  ;;  %1496 = vmatprep.subr.mxu1 %v262_v20  ;;  %v2048_v51 = vand.u32 4294901760, %v2038_v41  ;;  %v311_v58 = vand.u32 4294901760, %v310_v48 }
  0x26   :  { %v296_v15 = vsub.f32 %v1988_v50, %v2001_v61 }
  0x27   :  { %v317_v0 = vsub.f32 %v2038_v41, %v2048_v51 }
  0x28   :  { %1466 = vmatpush3.xpose.msra.mxu0 %v1899_v52  ;;  %1497 = vmatpush3.xpose.msra.mxu1 %v262_v20  ;;  %v2021_v20 = vand.u32 4294901760, %v2004_v63  ;;  %v297_v32 = vand.u32 4294901760, %v296_v15 }
  0x29   :  { %1467 = vmatprep.subr.mxu0 %v1920_v62  ;;  %1498 = vmatprep.subr.mxu1 %v269_v33  ;;  %v318_v7 = vand.u32 4294901760, %v317_v0 }
  0x2c   :  { %1468 = vmatpush3.xpose.msra.mxu0 %v1920_v62  ;;  %1499 = vmatpush3.xpose.msra.mxu1 %v269_v33  ;;  %v303_v33 = vsub.f32 %v2004_v63, %v2021_v20 }
  0x2d   :  { %1469 = vmatprep.subr.mxu0 %v1943_v8  ;;  %1500 = vmatprep.subr.mxu1 %v276_v46 }
  0x30   :  { %1470 = vmatpush3.xpose.msra.mxu0 %v1943_v8  ;;  %1501 = vmatpush3.xpose.msra.mxu1 %v276_v46  ;;  %v304_v46 = vand.u32 4294901760, %v303_v33  ;;  %v1290_v33 = vld [vmem:[#allocation2] sm:$0x1] }
  0x31   :  { %1471 = vmatprep.subr.mxu0 %v1962_v31  ;;  %1502 = vmatprep.subr.mxu1 %v283_v56 }
  0x32   :  { %1293 = vperm.xlu0 %1705, %v1290_v33  }
  0x34   :  { %1472 = vmatpush3.xpose.msra.mxu0 %v1962_v31  ;;  %1503 = vmatpush3.xpose.msra.mxu1 %v283_v56  ;;  %v2051_v56 = vsub.f32 %v67_v6, %v2029_v29  ;;  %v208_v6 = vsub.f32 %v2041_v45, %v207_v55 }
  0x35   :  { %1473 = vmatprep.subr.mxu0 %v1978_v42  ;;  %1504 = vmatprep.subr.mxu1 %v290_v12 }
  0x36   :  { %v2059_v1 = vand.u32 4294901760, %v2051_v56  ;;  %v209_v15 = vand.u32 4294901760, %v208_v6 }
  0x38   :  { %1474 = vmatpush3.xpose.msra.mxu0 %v1978_v42  ;;  %1505 = vmatpush3.xpose.msra.mxu1 %v290_v12  ;;  %v324_v12 = vsub.f32 %v2051_v56, %v2059_v1 }
  0x39   :  { %1475 = vmatprep.subr.mxu0 %v1994_v54  ;;  %1506 = vmatprep.subr.mxu1 %v297_v32 }
  0x3c   :  { %1476 = vmatpush3.xpose.msra.mxu0 %v1994_v54  ;;  %1507 = vmatpush3.xpose.msra.mxu1 %v297_v32  ;;  %v325_v32 = vand.u32 4294901760, %v324_v12 }
  0x3d   :  { %1477 = vmatprep.subr.mxu0 %v2013_v4  ;;  %1508 = vmatprep.subr.mxu1 %v304_v46 }
  0x40   :  { %1478 = vmatpush3.xpose.msra.mxu0 %v2013_v4  ;;  %1509 = vmatpush3.xpose.msra.mxu1 %v304_v46 }
  0x41   :  { %1479 = vmatprep.subr.mxu0 %v2029_v29  ;;  %1510 = vmatprep.subr.mxu1 %v311_v58 }
  0x44   :  { %1480 = vmatpush3.xpose.msra.mxu0 %v2029_v29  ;;  %1511 = vmatpush3.xpose.msra.mxu1 %v311_v58 }
  0x45   :  { %1512 = vmatprep.subr.mxu1 %v318_v7  ;;  %1519 = vmatprep.subr.mxu0 %v1813_v16 }
  0x47   :  { %1482 = vmatmul.mubr.f32.vlgmr.msra.gmra.mxu0 %v209_v15 }
  0x48   :  { %1513 = vmatpush3.xpose.msra.mxu1 %v318_v7  ;;  %1520 = vmatpush3.xpose.msra.mxu0 %v1813_v16 }
  0x49   :  { %1514 = vmatprep.subr.mxu1 %v325_v32  ;;  %1521 = vmatprep.subr.mxu0 %v1816_v17 }
  0x4a   :  { %1551 = vmatprep.mubr.f32.mxu0 %v1916_v60 }
  0x4c   :  { %1515 = vmatpush3.xpose.msra.mxu1 %v325_v32  ;;  %1522 = vmatpush3.xpose.msra.mxu0 %v1816_v17  ;;  %v800_v17 = vld [vmem:[%s2253_s3] sm:$0x1f]  ;;  %s1736_s3 = smov [#allocation3]  }
  0x4d   :  { %1523 = vmatprep.subr.mxu0 %v1819_v18  ;;  %1554 = vmatprep.subr.mxu1 %v1798_v9 }
  0x4f   :  { %1517 = vmatmul.mubr.f32.vlgmr.msra.gmra.mxu1 %v2026_v27 }
  0x50   :  { %1524 = vmatpush3.xpose.msra.mxu0 %v1819_v18  ;;  %1555 = vmatpush3.xpose.msra.mxu1 %v1798_v9 }
  0x51   :  { %1525 = vmatprep.subr.mxu0 %v1836_v24  ;;  %1556 = vmatprep.subr.mxu1 %v1800_v10 }
  0x52   :  { %1586 = vmatprep.mubr.f32.mxu1 %v197_v5 }
  0x54   :  { %1526 = vmatpush3.xpose.msra.mxu0 %v1836_v24  ;;  %1557 = vmatpush3.xpose.msra.mxu1 %v1800_v10 }
  0x55   :  { %1527 = vmatprep.subr.mxu0 %v1850_v30  ;;  %1558 = vmatprep.subr.mxu1 %v1802_v11 }
  0x58   :  { %1528 = vmatpush3.xpose.msra.mxu0 %v1850_v30  ;;  %1559 = vmatpush3.xpose.msra.mxu1 %v1802_v11 }
  0x59   :  { %1529 = vmatprep.subr.mxu0 %v1865_v37  ;;  %1560 = vmatprep.subr.mxu1 %v1808_v14 }
  0x5c   :  { %1530 = vmatpush3.xpose.msra.mxu0 %v1865_v37  ;;  %1561 = vmatpush3.xpose.msra.mxu1 %v1808_v14 }
  0x5d   :  { %1531 = vmatprep.subr.mxu0 %v1882_v44  ;;  %1562 = vmatprep.subr.mxu1 %v1822_v19 }
  0x60   :  { %1532 = vmatpush3.xpose.msra.mxu0 %v1882_v44  ;;  %1563 = vmatpush3.xpose.msra.mxu1 %v1822_v19 }
  0x61   :  { %1533 = vmatprep.subr.mxu0 %v1908_v57  ;;  %1564 = vmatprep.subr.mxu1 %v1846_v28 }
  0x64   :  { %1534 = vmatpush3.xpose.msra.mxu0 %v1908_v57  ;;  %1565 = vmatpush3.xpose.msra.mxu1 %v1846_v28 }
  0x65   :  { %1535 = vmatprep.subr.mxu0 %v1933_v3  ;;  %1566 = vmatprep.subr.mxu1 %v1862_v36 }
  0x68   :  { %1536 = vmatpush3.xpose.msra.mxu0 %v1933_v3  ;;  %1567 = vmatpush3.xpose.msra.mxu1 %v1862_v36 }
  0x69   :  { %1537 = vmatprep.subr.mxu0 %v1947_v13  ;;  %1568 = vmatprep.subr.mxu1 %v1887_v47 }
  0x6c   :  { %1538 = vmatpush3.xpose.msra.mxu0 %v1947_v13  ;;  %1569 = vmatpush3.xpose.msra.mxu1 %v1887_v47 }
  0x6d   :  { %1539 = vmatprep.subr.mxu0 %v1972_v39  ;;  %1570 = vmatprep.subr.mxu1 %v1899_v52 }
  0x70   :  { %1540 = vmatpush3.xpose.msra.mxu0 %v1972_v39  ;;  %1571 = vmatpush3.xpose.msra.mxu1 %v1899_v52 }
  0x71   :  { %1541 = vmatprep.subr.mxu0 %v1988_v50  ;;  %1572 = vmatprep.subr.mxu1 %v1920_v62 }
  0x74   :  { %1542 = vmatpush3.xpose.msra.mxu0 %v1988_v50  ;;  %1573 = vmatpush3.xpose.msra.mxu1 %v1920_v62 }
  0x75   :  { %1543 = vmatprep.subr.mxu0 %v2004_v63  ;;  %1574 = vmatprep.subr.mxu1 %v1943_v8 }
  0x78   :  { %1544 = vmatpush3.xpose.msra.mxu0 %v2004_v63  ;;  %1575 = vmatpush3.xpose.msra.mxu1 %v1943_v8 }
  0x79   :  { %1545 = vmatprep.subr.mxu0 %v2024_v25  ;;  %1576 = vmatprep.subr.mxu1 %v1962_v31 }
  0x7c   :  { %1546 = vmatpush3.xpose.msra.mxu0 %v2024_v25  ;;  %1577 = vmatpush3.xpose.msra.mxu1 %v1962_v31 }
  0x7d   :  { %1547 = vmatprep.subr.mxu0 %v2038_v41  ;;  %1578 = vmatprep.subr.mxu1 %v1978_v42 }
  0x80   :  { %1548 = vmatpush3.xpose.msra.mxu0 %v2038_v41  ;;  %1579 = vmatpush3.xpose.msra.mxu1 %v1978_v42 }
  0x81   :  { %1549 = vmatprep.subr.mxu0 %v2051_v56  ;;  %1580 = vmatprep.subr.mxu1 %v1994_v54 }
  0x84   :  { %1550 = vmatpush3.xpose.msra.mxu0 %v2051_v56  ;;  %1581 = vmatpush3.xpose.msra.mxu1 %v1994_v54 }
  0x85   :  { %1582 = vmatprep.subr.mxu1 %v2013_v4  ;;  %1589 = vmatprep.subr.mxu0 %v1827_v21 }
  0x87   :  { %1552 = vmatmul.mubr.f32.vlgmr.msra.gmra.mxu0 %v2041_v45 }
  0x88   :  { %1583 = vmatpush3.xpose.msra.mxu1 %v2013_v4  ;;  %1590 = vmatpush3.xpose.msra.mxu0 %v1827_v21 }
  0x89   :  { %1584 = vmatprep.subr.mxu1 %v2029_v29  ;;  %1591 = vmatprep.subr.mxu0 %v1830_v22 }
  0x8a   :  { %1621 = vmatprep.mubr.f32.mxu0 %v1913_v59 }
  0x8c   :  { %1585 = vmatpush3.xpose.msra.mxu1 %v2029_v29  ;;  %1592 = vmatpush3.xpose.msra.mxu0 %v1830_v22 }
  0x8d   :  { %1593 = vmatprep.subr.mxu0 %v1833_v23  ;;  %1624 = vmatprep.subr.mxu1 %v1798_v9 }
  0x8f   :  { %1587 = vmatmul.mubr.f32.vlgmr.msra.gmra.mxu1 %v207_v55 }
  0x90   :  { %1594 = vmatpush3.xpose.msra.mxu0 %v1833_v23  ;;  %1625 = vmatpush3.xpose.msra.mxu1 %v1798_v9  ;;  %v1734_v9 = vmov 0.0   ;;  %v809_v23 = vsel %vm807_vm2, %v800_v17, 0 }
  0x91   :  { %1595 = vmatprep.subr.mxu0 %v1856_v34  ;;  %1626 = vmatprep.subr.mxu1 %v1800_v10 }
  0x92   :  { %1656 = vmatprep.mubr.f32.mxu1 %v1913_v59 }
  0x94   :  { %1596 = vmatpush3.xpose.msra.mxu0 %v1856_v34  ;;  %1627 = vmatpush3.xpose.msra.mxu1 %v1800_v10  ;;  %v801_v10 = vld [vmem:[%s2254_s4] sm:$0x1f]  ;;  %v2223_v34 = vand.u32 4294901760, %v809_v23  ;;  %s1314_s4 = sshll.u32 %s1736_s3, 4  ;;  %s1315_s4 = int_to_ptr.vmem [resolvable:$true] %s1314_s4 }
  0x95   :  { %1597 = vmatprep.subr.mxu0 %v1871_v40  ;;  %1628 = vmatprep.subr.mxu1 %v1802_v11  ;;  %s1715_s21 = scalar_lea.vmem %s1315_s4, 32  ;;  %p1716_p1 = scmp.lt.s32.totalorder %s1315_s4, %s1315_s4 }
  0x96   :  { %804 = vperm.xlu1 %1706, %v801_v10  }
  0x98   :  { %1598 = vmatpush3.xpose.msra.mxu0 %v1871_v40  ;;  %1629 = vmatpush3.xpose.msra.mxu1 %v1802_v11  ;;  %v1275_v11 = vld [vmem:[%s2255_s5] sm:$0x1f]  ;;  %s1711_s5 = scalar_lea.vmem %s1315_s4, 16 }
  0x99   :  { %1599 = vmatprep.subr.mxu0 %v1879_v43  ;;  %1630 = vmatprep.subr.mxu1 %v1808_v14  ;;  %p1712_p0 = scmp.ne.s32.totalorder %s1315_s4, %s1711_s5  ;;  %p1717_p2 = scmp.lt.s32.totalorder %s1715_s21, %s1711_s5 }
  0x9a   :  { %1278 = vperm.xlu1 %1706, %v1275_v11  }
  0x9b   :  { %p1718_p3 = por %p1717_p2, %p1716_p1 }
  0x9c   :  { %1600 = vmatpush3.xpose.msra.mxu0 %v1879_v43  ;;  %1631 = vmatpush3.xpose.msra.mxu1 %v1808_v14  ;;  %v57_v14 = vpop.permute.xlu0 %56 }
  0x9d   :  { %1601 = vmatprep.subr.mxu0 %v1902_v53  ;;  %1632 = vmatprep.subr.mxu1 %v1822_v19  ;;  %p1719_p4 = pnand %p1718_p3, %p1712_p0 }
  0xa0   :  { %1602 = vmatpush3.xpose.msra.mxu0 %v1902_v53  ;;  %1633 = vmatpush3.xpose.msra.mxu1 %v1822_v19  ;;  %v52_v21 = vpop.permute.xlu0 %51 }
  0xa1   :  { %1603 = vmatprep.subr.mxu0 %v1930_v2  ;;  %1634 = vmatprep.subr.mxu1 %v1846_v28 }
  0xa4   :  { %1604 = vmatpush3.xpose.msra.mxu0 %v1930_v2  ;;  %1635 = vmatpush3.xpose.msra.mxu1 %v1846_v28 }
  0xa5   :  { %1605 = vmatprep.subr.mxu0 %v1956_v26  ;;  %1636 = vmatprep.subr.mxu1 %v1862_v36 }
  0xa8   :  { %1606 = vmatpush3.xpose.msra.mxu0 %v1956_v26  ;;  %1637 = vmatpush3.xpose.msra.mxu1 %v1862_v36 }
  0xa9   :  { %1607 = vmatprep.subr.mxu0 %v1969_v38  ;;  %1638 = vmatprep.subr.mxu1 %v1887_v47 }
  0xac   :  { %1608 = vmatpush3.xpose.msra.mxu0 %v1969_v38  ;;  %1639 = vmatpush3.xpose.msra.mxu1 %v1887_v47 }
  0xad   :  { %1609 = vmatprep.subr.mxu0 %v1985_v49  ;;  %1640 = vmatprep.subr.mxu1 %v1899_v52 }
  0xb0   :  { %1610 = vmatpush3.xpose.msra.mxu0 %v1985_v49  ;;  %1641 = vmatpush3.xpose.msra.mxu1 %v1899_v52  ;;  %v883_v52 = vsub.f32 %v809_v23, %v2223_v34 }
  0xb1   :  { %1611 = vmatprep.subr.mxu0 %v2001_v61  ;;  %1642 = vmatprep.subr.mxu1 %v1920_v62 }
  0xb2   :  { %v884_v3 = vand.u32 4294901760, %v883_v52 }
  0xb4   :  { %1612 = vmatpush3.xpose.msra.mxu0 %v2001_v61  ;;  %1643 = vmatpush3.xpose.msra.mxu1 %v1920_v62  ;;  %v885_v39 = vsub.f32 %v883_v52, %v884_v3 }
  0xb5   :  { %1613 = vmatprep.subr.mxu0 %v2021_v20  ;;  %1644 = vmatprep.subr.mxu1 %v1943_v8 }
  0xb6   :  { %v886_v61 = vand.u32 4294901760, %v885_v39 }
  0xb8   :  { %1614 = vmatpush3.xpose.msra.mxu0 %v2021_v20  ;;  %1645 = vmatpush3.xpose.msra.mxu1 %v1943_v8 }
  0xb9   :  { %1615 = vmatprep.subr.mxu0 %v2035_v35  ;;  %1646 = vmatprep.subr.mxu1 %v1962_v31 }
  0xbc   :  { %1616 = vmatpush3.xpose.msra.mxu0 %v2035_v35  ;;  %1647 = vmatpush3.xpose.msra.mxu1 %v1962_v31 }
  0xbd   :  { %1617 = vmatprep.subr.mxu0 %v2048_v51  ;;  %1648 = vmatprep.subr.mxu1 %v1978_v42 }
  0xc0   :  { %1618 = vmatpush3.xpose.msra.mxu0 %v2048_v51  ;;  %1649 = vmatpush3.xpose.msra.mxu1 %v1978_v42 }
  0xc1   :  { %1619 = vmatprep.subr.mxu0 %v2059_v1  ;;  %1650 = vmatprep.subr.mxu1 %v1994_v54 }
  0xc4   :  { %1620 = vmatpush3.xpose.msra.mxu0 %v2059_v1  ;;  %1651 = vmatpush3.xpose.msra.mxu1 %v1994_v54 }
  0xc5   :  { %1652 = vmatprep.subr.mxu1 %v2013_v4  ;;  %1659 = vmatprep.subr.mxu0 %v1734_v9 }
  0xc7   :  { %1622 = vmatmul.mubr.f32.vlgmr.msra.gmra.mxu0 %v2026_v27 }
  0xc8   :  { %1653 = vmatpush3.xpose.msra.mxu1 %v2013_v4  ;;  %1663 = vmatprep.mubr.msk.f32.mxu0 %vm1735_vm1, %v1734_v9 }
  0xc9   :  { %1654 = vmatprep.subr.mxu1 %v2029_v29 }
  0xcc   :  { %1655 = vmatpush3.xpose.msra.mxu1 %v2029_v29 }
  0xcd   :  { %1666 = vmatprep.subr.mxu1 %v1734_v9 }
  0xcf   :  { %1657 = vmatmul.mubr.f32.vlgmr.msra.gmra.mxu1 %v2026_v27 }
  0xd0   :  { %1670 = vmatprep.mubr.msk.f32.mxu1 %vm1735_vm1, %v1734_v9 }
 0x107   :  { %v1483_v16 = vpop.f32.mrf.mxu0 }
 0x108   :  { %v212_v24 = vadd.f32 %v1483_v16, %v57_v14 }
 0x109   :  { %v201_v18 = vpop.f32.mrf.mxu0 }
 0x10a   :  { %v202_v30 = vadd.f32 %v201_v18, %v52_v21 }
 0x10f   :  { %v1518_v19 = vpop.f32.mrf.mxu1 }
 0x110   :  { %v369_v40 = vadd.f32 %v1518_v19, %v212_v24  ;;  %v1296_v19 = vlaneseq }
 0x111   :  { %v362_v28 = vpop.f32.mrf.mxu1  ;;  %v805_v48 = vpop.permute.xlu1 %804 }
 0x112   :  { %v363_v44 = vadd.f32 %v362_v28, %v202_v30  ;;  %v1297_v23 = vshrl.u32 %v1296_v19, 7 }
 0x114   :  { %v1298_v30 = vsub.s32 0, %v1297_v23 }
 0x115   :  { %v1279_v17 = vpop.permute.xlu1 %1278 }
 0x147   :  { %v1553_v22 = vpop.f32.mrf.mxu0 }
 0x148   :  { %v480_v47 = vadd.f32 %v1553_v22, %v369_v40 }
 0x149   :  { %v472_v36 = vpop.f32.mrf.mxu0 }
 0x14a   :  { %v473_v57 = vadd.f32 %v472_v36, %v363_v44  ;;  %v1294_v36 = vpop.permute.xlu0 %1293 }
 0x14b   :  { %v1299_v40 = vrot.slane %v1294_v36, %v1298_v30 }
 0x14f   :  { %v1588_v37 = vpop.f32.mrf.mxu1 }
 0x150   :  { %v577_v59 = vadd.f32 %v1588_v37, %v480_v47 }
 0x151   :  { %v568_v53 = vpop.f32.mrf.mxu1 }
 0x152   :  { %v569_v62 = vadd.f32 %v568_v53, %v473_v57 }
 0x187   :  { %v1623_v43 = vpop.f32.mrf.mxu0 }
 0x188   :  { %v702_v2 = vadd.f32 %v1623_v43, %v577_v59 }
 0x189   :  { %v695_v60 = vpop.f32.mrf.mxu0 }
 0x18a   :  { %v696_v8 = vadd.f32 %v695_v60, %v569_v62 }
 0x18f   :  { %v1658_v5 = vpop.f32.mrf.mxu1 }
 0x190   :  { %v795_v13 = vadd.f32 %v1658_v5, %v702_v2 }
 0x191   :  { %v788_v26 = vpop.f32.mrf.mxu1 }
 0x192   :  { %v799_v31 = vmax.f32 %v795_v13, 0.0  ;;  %v789_v38 = vadd.f32 %v788_v26, %v696_v8 }
 0x194   :  { %v813_v42 = vsel %vm811_vm3, %v799_v31, 0  ;;  %v798_v49 = vmax.f32 %v789_v38, 0.0 }
 0x195   :  { %v844_v50 = vand.u32 4294901760, %v813_v42 }
 0x196   :  { %v847_v54 = vand.u32 4294901760, %v798_v49 }
 0x197   :  { %v922_v63 = vsub.f32 %v813_v42, %v844_v50  ;;  %1660 = vmatpush3.msra.mxu0 %v844_v50 }
 0x198   :  { %v929_v4 = vsub.f32 %v798_v49, %v847_v54  ;;  %1661 = vmatprep.subr.mxu0 %v1734_v9 }
 0x199   :  { %v923_v20 = vand.u32 4294901760, %v922_v63  ;;  %1662 = vmatpush3.msra.mxu0 %v847_v54 }
 0x19a   :  { %v930_v25 = vand.u32 4294901760, %v929_v4  ;;  %1673 = vmatprep.subr.mxu0 %v1734_v9  ;;  %1664 = vmatmul.mubr.f32.vlgmr.msra.gmra.mxu0 %v886_v61 }
 0x19b   :  { %1674 = vmatpush3.msra.mxu0 %v922_v63  ;;  %1677 = vmatprep.mubr.msk.f32.mxu0 %vm1735_vm1, %v1734_v9  ;;  %v924_v27 = vsub.f32 %v922_v63, %v923_v20 }
 0x19c   :  { %v931_v29 = vsub.f32 %v929_v4, %v930_v25  ;;  %1675 = vmatprep.subr.mxu0 %v1734_v9 }
 0x19d   :  { %1676 = vmatpush3.msra.mxu0 %v929_v4  ;;  %v925_v35 = vand.u32 4294901760, %v924_v27 }
 0x19e   :  { %1687 = vmatprep.subr.mxu0 %v1734_v9  ;;  %1678 = vmatmul.mubr.f32.vlgmr.msra.gmra.mxu0 %v883_v52  ;;  %v932_v41 = vand.u32 4294901760, %v931_v29 }
 0x19f   :  { %1667 = vmatpush3.msra.mxu1 %v925_v35  ;;  %1688 = vmatpush3.msra.mxu0 %v923_v20 }
 0x1a0   :  { %1668 = vmatprep.subr.mxu1 %v1734_v9  ;;  %1689 = vmatprep.subr.mxu0 %v1734_v9 }
 0x1a1   :  { %1669 = vmatpush3.msra.mxu1 %v932_v41  ;;  %1690 = vmatpush3.msra.mxu0 %v930_v25 }
 0x1a2   :  { %1671 = vmatmul.mubr.f32.vlgmr.msra.gmra.mxu1 %v2223_v34  ;;  %1680 = vmatprep.subr.mxu1 %v1734_v9 }
 0x1a3   :  { %1681 = vmatpush3.msra.mxu1 %v844_v50  ;;  %1684 = vmatprep.mubr.msk.f32.mxu1 %vm1735_vm1, %v1734_v9 }
 0x1a4   :  { %1682 = vmatprep.subr.mxu1 %v1734_v9  ;;  %1691 = vmatprep.mubr.msk.f32.mxu0 %vm1735_vm1, %v1734_v9 }
 0x1a5   :  { %1683 = vmatpush3.msra.mxu1 %v847_v54  ;;  %1692 = vmatmul.mubr.f32.vlgmr.msra.gmra.mxu0 %v2223_v34 }
 0x1a6   :  { %1685 = vmatmul.mubr.f32.vlgmr.msra.gmra.mxu1 %v884_v3  ;;  %1694 = vmatprep.subr.mxu1 %v1734_v9 }
 0x1a7   :  { %1695 = vmatpush3.msra.mxu1 %v844_v50  ;;  %1698 = vmatprep.mubr.msk.f32.mxu1 %vm1735_vm1, %v1734_v9 }
 0x1a8   :  { %1696 = vmatprep.subr.mxu1 %v1734_v9 }
 0x1a9   :  { %1697 = vmatpush3.msra.mxu1 %v847_v54 }
 0x1aa   :  { %1699 = vmatmul.mubr.f32.vlgmr.msra.gmra.mxu1 %v2223_v34 }
 0x25a   :  { %v888_v45 = vpop.f32.mrf.mxu0 }
 0x25b   :  { %v889_v56 = vadd.f32 %v888_v45, %v805_v48 }
 0x25c   :  { %v1665_v46 = vpop.f32.mrf.mxu0 }
 0x25e   :  { %v1045_v51 = vpop.f32.mrf.mxu0 }
 0x260   :  { %v1679_v55 = vpop.f32.mrf.mxu0 }
 0x262   :  { %v969_v58 = vpop.f32.mrf.mxu1 }
 0x263   :  { %v970_v0 = vadd.f32 %v969_v58, %v889_v56 }
 0x264   :  { %v1672_v1 = vpop.f32.mrf.mxu1 }
 0x265   :  { %v1046_v6 = vadd.f32 %v1045_v51, %v970_v0  ;;  %v1197_v7 = vpop.f32.mrf.mxu0 }
 0x266   :  { %v1120_v12 = vpop.f32.mrf.mxu1 }
 0x267   :  { %v1121_v15 = vadd.f32 %v1120_v12, %v1046_v6  ;;  %v1693_v32 = vpop.f32.mrf.mxu0 }
 0x268   :  { %v1686_v33 = vpop.f32.mrf.mxu1 }
 0x269   :  { %v1198_v10 = vadd.f32 %v1197_v7, %v1121_v15 }
 0x26a   :  { %v1270_v9 = vpop.f32.mrf.mxu1 }
 0x26b   :  { %v1271_v11 = vadd.f32 %v1270_v9, %v1198_v10 }
 0x26c   :  { %v1700_v14 = vpop.f32.mrf.mxu1 }
 0x26d   :  { %v1274_v16 = vmax.f32 %v1271_v11, 0.0 }
 0x26f   :  { %v1281_v18 = vmul.f32 %v1279_v17, %v1274_v16 }
 0x271   :  { %v1283_v21 = vsel %vm1282_vm4, %v1281_v18, 0.0 }
 0x272   :  { %v1284_v22 = vrot.slane %v1283_v21, 4 }
 0x274   :  { %v1285_v24 = vadd.f32 %v1284_v22, %v1283_v21 }
 0x276   :  { %v1286_v28 = vrot.slane %v1285_v24, 2 }
 0x278   :  { %v1287_v34 = vadd.f32 %v1286_v28, %v1285_v24 }
 0x27a   :  { %v1288_v37 = vrot.slane %v1287_v34, 1 }
 0x27c   :  { %v1289_v43 = vadd.f32 %v1288_v37, %v1287_v34 }
 0x27e   :  { %v1300_v44 = vadd.f32 %v1299_v40, %v1289_v43 }
 0x280   :  { %v1322_v47 = vmul.f32 -1.442695, %v1300_v44 }
 0x282   :  { %1707 = vpow2.f32 %v1322_v47 }
 0x28f   :  { %v1708_v52 = vpop.eup %1707 }
 0x290   :  { %v1304_v53 = vadd.f32 1.0, %v1708_v52 }
 0x292   :  { %1709 = vrcp.f32 %v1304_v53 }
 0x29f   :  { %v1710_v57 = vpop.eup %1709 }
 0x2a0   :  { %1307 = vst [vmem:[#allocation3] sm:$0x1] %v1710_v57 }
 0x2a1   :  { %1722 = shalt.err (!%p1719_p4)
}
 0x2a2   :  { %1317 = dma.vmem_to_hbm [thread:$0]  %s1315_s4, 16, %s2257_s7, [#allocation4]  }
 0x2a3   :  { %1731 = dma.done.wait [#allocation4], 16  }
 0x2a4   :  { %1732 = vsyncadd [#allocation4], 4294967280 }
 0x2a5   :  { %1321 = vsyncpa [#allocation4], 1 }

</bundles_post_ra>
